<compile_context>
chip_gen: v7x
topology: tpu7x:2x2x1
jax: 0.10.0
libtpu: 0.0.40
codegen_flags: <defaults>
</compile_context>

<pallas_src>
import functools

import jax
import jax.numpy as jnp
from jax.experimental import pallas as pl
from jax.experimental.pallas import tpu as pltpu

_LANE = 128
_SUBLANE_F32 = 8


def _round_up(n, m):
    return ((n + m - 1) // m) * m


def _sublane_granularity(*dtypes):
    """Minimum second-to-last block dim given the boundary (HBM-facing) dtypes."""
    g = _SUBLANE_F32
    for dt in dtypes:
        itemsize = jnp.dtype(dt).itemsize
        g = max(g, _SUBLANE_F32 * max(1, 4 // itemsize))  # f32->8, bf16->16, int8->32
    return g


@functools.lru_cache(maxsize=1)
def _vmem_capacity_bytes():
    """Per-core VMEM capacity; conservative fallback if the query fails."""
    try:
        info = pltpu.get_tpu_info()
        cap = int(getattr(info, "vmem_capacity_bytes", 0))
        if cap > 0:
            return cap
    except Exception:
        pass
    return 64 * 1024 * 1024  # v7x per-TensorCore VMEM (safe lower bound)


def mlp_kernel(x_ref, w1_ref, b1_ref, w2_ref, b2_ref, o_ref):
    # Cast x to the MXU operand dtype inside the kernel (VPU has slack; the
    # cast hides under the x tile DMA instead of being an extra HBM pass).
    x = x_ref[...].astype(w1_ref.dtype)
    # Layer 1: (tile_b, in) @ (in, h_pad) on the MXU, f32 accumulation.
    h = jnp.dot(x, w1_ref[...], preferred_element_type=jnp.float32)
    # Bias + ReLU in f32 on the VPU.
    h = jnp.maximum(h + b1_ref[...], 0.0)
    # Layer 2: cast activations down only for the matmul operand.
    y = jnp.dot(h.astype(w2_ref.dtype), w2_ref[...],
                preferred_element_type=jnp.float32)
    o_ref[...] = (y + b2_ref[...]).astype(o_ref.dtype)


def prepare_params(w1, b1, w2, b2, mxu_dtype=jnp.bfloat16):
    """One-time parameter prep (call once, NOT per forward).

    w1: [hidden, input], b1: [hidden], w2: [output, hidden], b2: [output]
    (PyTorch nn.Linear layout). Returns [in, out]-layout weights, the hidden
    dim zero-padded to a multiple of 128, weights in the MXU dtype and biases
    in f32. The output dim is intentionally left unpadded.
    """
    hidden, input_size = w1.shape
    output_size = w2.shape[0]
    h_pad = _round_up(hidden, _LANE)

    w1_t = jnp.zeros((input_size, h_pad), mxu_dtype)
    w1_t = w1_t.at[:, :hidden].set(jnp.transpose(w1).astype(mxu_dtype))
    b1_p = jnp.zeros((1, h_pad), jnp.float32)
    b1_p = b1_p.at[:, :hidden].set(b1.astype(jnp.float32).reshape(1, -1))

    # Zero-padded hidden rows of W2 are inert (ReLU(0)-scaled by 0 weights).
    w2_t = jnp.zeros((h_pad, output_size), mxu_dtype)
    w2_t = w2_t.at[:hidden, :].set(jnp.transpose(w2).astype(mxu_dtype))
    b2_p = b2.astype(jnp.float32).reshape(1, -1)

    return w1_t, b1_p, w2_t, b2_p


def _pick_tile_b(batch, in_dim, h_pad, out_dim, mxu_bytes, gran, budget):
    """Largest batch tile (multiple of `gran`) under the VMEM budget."""
    per_row = (2 * in_dim * 4            # f32 x tile, double-buffered
               + in_dim * mxu_bytes      # in-kernel MXU-dtype copy of x tile
               + 2 * out_dim * 4         # f32 out tile, double-buffered
               + h_pad * 4               # f32 hidden activations
               + h_pad * mxu_bytes)      # MXU-dtype copy of hidden acts
    # Weights/biases are conservatively counted as double-buffered even
    # though their index_map is constant (see Buffered(1) TODO above).
    weight_bytes = 2 * ((in_dim * h_pad + h_pad * out_dim) * mxu_bytes
                        + (h_pad + out_dim) * 4)
    if weight_bytes > budget:
        # TODO(synk): fall back to a K-tiled grid with an f32 VMEM accumulator
        # instead of erroring for very large probes.
        raise ValueError(
            f"LinearProbe weights ({weight_bytes} B, double-buffered) exceed "
            f"the VMEM tiling budget ({budget} B); K-tiled path not implemented.")
    avail = budget - weight_bytes
    tile = max(gran, (avail // per_row) // gran * gran)
    tile = min(tile, 1024)                       # step-overhead amortization cap
    tile = min(tile, _round_up(batch, gran))     # never exceed (rounded) batch
    return int(tile)


@jax.jit
def linear_probe_thick(x, w1_t, b1, w2_t, b2):
    """x: [B, input_size]; params from prepare_params(). Returns [B, output_size]."""
    batch, in_dim = x.shape
    h_pad = w1_t.shape[1]
    out_dim = w2_t.shape[1]
    mxu_bytes = jnp.dtype(w1_t.dtype).itemsize

    vmem_cap = _vmem_capacity_bytes()
    budget = int(vmem_cap * 0.60)        # ~38 MiB on v7x, ~77 MiB on v5e/v6e
    vmem_limit = int(vmem_cap * 0.75)    # ~48 MiB on v7x, ~96 MiB on v5e/v6e

    gran = _sublane_granularity(x.dtype, x.dtype)   # x in / out both f32 here
    tile_b = _pick_tile_b(batch, in_dim, h_pad, out_dim, mxu_bytes, gran, budget)

    # Only sublane-level rounding of the batch (no-op when batch % gran == 0);
    # the grid itself may be ragged w.r.t. tile_b — Pallas masks the ragged
    # rows of the last tile, and rows are independent so garbage reads there
    # cannot contaminate valid output rows.
    b_rounded = _round_up(batch, gran)
    x_in = x if b_rounded == batch else jnp.pad(x, ((0, b_rounded - batch), (0, 0)))

    cost = pl.CostEstimate(
        flops=2 * batch * (in_dim * h_pad + h_pad * out_dim),
        transcendentals=0,
        bytes_accessed=(batch * in_dim * 4
                        + (in_dim * h_pad + h_pad * out_dim) * mxu_bytes
                        + (h_pad + out_dim) * 4
                        + batch * out_dim * 4),
    )

    out = pl.pallas_call(
        mlp_kernel,
        out_shape=jax.ShapeDtypeStruct((batch, out_dim), x.dtype),
        grid=(pl.cdiv(b_rounded, tile_b),),
        in_specs=[
            pl.BlockSpec((tile_b, in_dim), lambda i: (i, 0)),   # x: batch-tiled
            pl.BlockSpec((in_dim, h_pad), lambda i: (0, 0)),    # W1: VMEM-resident
            pl.BlockSpec((1, h_pad), lambda i: (0, 0)),         # b1: resident
            pl.BlockSpec((h_pad, out_dim), lambda i: (0, 0)),   # W2: resident
            pl.BlockSpec((1, out_dim), lambda i: (0, 0)),       # b2: resident
        ],
        out_specs=pl.BlockSpec((tile_b, out_dim), lambda i: (i, 0)),
        compiler_params=pltpu.CompilerParams(
            dimension_semantics=("parallel",),   # megacore sharding on v7x
            vmem_limit_bytes=vmem_limit,
        ),
        cost_estimate=cost,
    )(x_in, w1_t, b1, w2_t, b2)

    return out


def init_params(key, input_size, hidden_size, output_size, dtype=jnp.float32):
    """Deterministic init mimicking nn.Linear's uniform(-1/sqrt(fan_in), ...)."""
    k1, k2, k3, k4 = jax.random.split(key, 4)
    bound1 = 1.0 / (input_size ** 0.5)
    bound2 = 1.0 / (hidden_size ** 0.5)
    w1 = jax.random.uniform(k1, (hidden_size, input_size), dtype,
                            minval=-bound1, maxval=bound1)
    b1 = jax.random.uniform(k2, (hidden_size,), dtype,
                            minval=-bound1, maxval=bound1)
    w2 = jax.random.uniform(k3, (output_size, hidden_size), dtype,
                            minval=-bound2, maxval=bound2)
    b2 = jax.random.uniform(k4, (output_size,), dtype,
                            minval=-bound2, maxval=bound2)
    return w1, b1, w2, b2


if __name__ == "__main__":
    key = jax.random.PRNGKey(0)
    kx, kp = jax.random.split(key)

    batch, input_size, hidden_size, output_size = 8, 32, 64, 16
    x = jax.random.normal(kx, (batch, input_size), jnp.float32)
    w1, b1, w2, b2 = init_params(kp, input_size, hidden_size, output_size)

    # One-time parameter prep (transpose / pad hidden dim / bf16 cast).
    w1_t, b1_p, w2_t, b2_p = prepare_params(w1, b1, w2, b2,
                                            mxu_dtype=jnp.bfloat16)

    out = linear_probe_thick(x, w1_t, b1_p, w2_t, b2_p)
    out = jax.block_until_ready(out)

    # Reference in plain JAX f32 (same math as the PyTorch module).
    ref = jnp.maximum(x @ w1.T + b1, 0.0) @ w2.T + b2
    assert out.shape == (batch, output_size)
    # Loose tolerance: kernel uses bf16 MXU operands with f32 accumulation.
    max_err = float(jnp.max(jnp.abs(out - ref)))
    assert jnp.allclose(out, ref, atol=5e-2, rtol=5e-2), max_err

    print("KERNEL_OK")
</pallas_src>

<mosaic_0001>
module attributes {stable_mosaic.version = 11 : i64} {
  func.func @mlp_kernel(%arg0: i32, %arg1: memref<8x32xf32, #tpu.memory_space<vmem>>, %arg2: memref<32x128xbf16, #tpu.memory_space<vmem>>, %arg3: memref<1x128xf32, #tpu.memory_space<vmem>>, %arg4: memref<128x16xbf16, #tpu.memory_space<vmem>>, %arg5: memref<1x16xf32, #tpu.memory_space<vmem>>, %arg6: memref<8x16xf32, #tpu.memory_space<vmem>>) attributes {dimension_semantics = [#tpu.dimension_semantics<parallel>], iteration_bounds = array<i64: 1>, scalar_prefetch = 0 : i64, scratch_operands = 0 : i64, tpu.core_type = #tpu.core_type<tc>, window_params = [{transform_indices = @transform_0, window_bounds = array<i64: 8, 32>}, {pipeline_mode = #tpu.pipeline_mode<synchronous>, transform_indices = @transform_1, window_bounds = array<i64: 32, 128>}, {pipeline_mode = #tpu.pipeline_mode<synchronous>, transform_indices = @transform_2, window_bounds = array<i64: 1, 128>}, {pipeline_mode = #tpu.pipeline_mode<synchronous>, transform_indices = @transform_3, window_bounds = array<i64: 128, 16>}, {pipeline_mode = #tpu.pipeline_mode<synchronous>, transform_indices = @transform_4, window_bounds = array<i64: 1, 16>}, {transform_indices = @transform_5, window_bounds = array<i64: 8, 16>}]} {
    %c0 = arith.constant 0 : index
    %c0_0 = arith.constant 0 : index
    %0 = vector.load %arg1[%c0, %c0_0] : memref<8x32xf32, #tpu.memory_space<vmem>>, vector<8x32xf32>
    %1 = arith.truncf %0 : vector<8x32xf32> to vector<8x32xbf16>
    %c0_1 = arith.constant 0 : index
    %c0_2 = arith.constant 0 : index
    %2 = vector.load %arg2[%c0_1, %c0_2] : memref<32x128xbf16, #tpu.memory_space<vmem>>, vector<32x128xbf16>
    %cst = arith.constant dense<0.000000e+00> : vector<8x128xf32>
    %3 = tpu.matmul %1, %2, %cst {dimension_numbers = #tpu.dot_dimension_numbers<[1], [0], [0], [1], [0, 0, 1, 1], [], []>} : vector<8x32xbf16>, vector<32x128xbf16>, vector<8x128xf32> -> vector<8x128xf32>
    %c0_3 = arith.constant 0 : index
    %c0_4 = arith.constant 0 : index
    %4 = vector.load %arg3[%c0_3, %c0_4] : memref<1x128xf32, #tpu.memory_space<vmem>>, vector<1x128xf32>
    %5 = vector.broadcast %4 : vector<1x128xf32> to vector<8x128xf32>
    %6 = arith.addf %3, %5 : vector<8x128xf32>
    %cst_5 = arith.constant 0.000000e+00 : f32
    %7 = vector.broadcast %cst_5 : f32 to vector<8x128xf32>
    %8 = arith.maximumf %6, %7 : vector<8x128xf32>
    %9 = arith.truncf %8 : vector<8x128xf32> to vector<8x128xbf16>
    %c0_6 = arith.constant 0 : index
    %c0_7 = arith.constant 0 : index
    %10 = vector.load %arg4[%c0_6, %c0_7] : memref<128x16xbf16, #tpu.memory_space<vmem>>, vector<128x16xbf16>
    %cst_8 = arith.constant dense<0.000000e+00> : vector<8x16xf32>
    %11 = tpu.matmul %9, %10, %cst_8 {dimension_numbers = #tpu.dot_dimension_numbers<[1], [0], [0], [1], [0, 0, 1, 1], [], []>} : vector<8x128xbf16>, vector<128x16xbf16>, vector<8x16xf32> -> vector<8x16xf32>
    %c0_9 = arith.constant 0 : index
    %c0_10 = arith.constant 0 : index
    %12 = vector.load %arg5[%c0_9, %c0_10] : memref<1x16xf32, #tpu.memory_space<vmem>>, vector<1x16xf32>
    %13 = vector.broadcast %12 : vector<1x16xf32> to vector<8x16xf32>
    %14 = arith.addf %11, %13 : vector<8x16xf32>
    %c0_11 = arith.constant 0 : index
    %c0_12 = arith.constant 0 : index
    %15 = vector.load %arg6[%c0_11, %c0_12] : memref<8x16xf32, #tpu.memory_space<vmem>>, vector<8x16xf32>
    tpu.vector_store %arg6[%c0_11, %c0_12], %14 {strides = array<i32>} : memref<8x16xf32, #tpu.memory_space<vmem>>, vector<8x16xf32>,
    return
  }
  func.func @transform_0(%arg0: i32) -> (i32, i32) {
    %c0_i32 = arith.constant 0 : i32
    %c0_i32_0 = arith.constant 0 : i32
    return %arg0, %c0_i32 : i32, i32
  }
  func.func @transform_1(%arg0: i32) -> (i32, i32) {
    %c0_i32 = arith.constant 0 : i32
    %c0_i32_0 = arith.constant 0 : i32
    %c0_i32_1 = arith.constant 0 : i32
    return %c0_i32, %c0_i32_0 : i32, i32
  }
  func.func @transform_2(%arg0: i32) -> (i32, i32) {
    %c0_i32 = arith.constant 0 : i32
    %c0_i32_0 = arith.constant 0 : i32
    %c0_i32_1 = arith.constant 0 : i32
    return %c0_i32, %c0_i32_0 : i32, i32
  }
  func.func @transform_3(%arg0: i32) -> (i32, i32) {
    %c0_i32 = arith.constant 0 : i32
    %c0_i32_0 = arith.constant 0 : i32
    %c0_i32_1 = arith.constant 0 : i32
    return %c0_i32, %c0_i32_0 : i32, i32
  }
  func.func @transform_4(%arg0: i32) -> (i32, i32) {
    %c0_i32 = arith.constant 0 : i32
    %c0_i32_0 = arith.constant 0 : i32
    %c0_i32_1 = arith.constant 0 : i32
    return %c0_i32, %c0_i32_0 : i32, i32
  }
  func.func @transform_5(%arg0: i32) -> (i32, i32) {
    %c0_i32 = arith.constant 0 : i32
    %c0_i32_0 = arith.constant 0 : i32
    return %arg0, %c0_i32 : i32, i32
  }
}

</mosaic_0001>

<bundles_post_ra>
// kernel: linear_probe_thick.1
= control target key start
LH: loop header
LB: loop body
LE: loop exit
PB: predicated region body
PF: predicated region fallthrough
CT: control target
= control target key end

     0   :  { %v310_v1 = vmov 0.0   ;;  %vm311_vm0 = vmmov 0   ;;  %vm47_vm1 = vcmask 261120   ;;  %s394_s0 = inlined_call_operand.vmem [shape: f32[8,32], index: 0, kind: input, shape index: {}]   ;;  %s395_s1 = inlined_call_operand.vmem [shape: bf16[32,128], index: 1, kind: input, shape index: {}]   ;;  %s396_s2 = inlined_call_operand.vmem [shape: f32[1,128], index: 2, kind: input, shape index: {}]   ;;  %s397_s3 = inlined_call_operand.vmem [shape: bf16[128,16], index: 3, kind: input, shape index: {}]   ;;  %s398_s4 = inlined_call_operand.vmem [shape: f32[1,16], index: 4, kind: input, shape index: {}]   ;;  %s399_s5 = inlined_call_operand.hbm [shape: f32[8,16], index: 5, kind: output, shape index: {}]  }
   0x1   :  { %v276_v0 = vld [vmem:[%s395_s1] sm:$0xff]   ;;  %245 = vmatprep.subr.bf16.mxu0 %v310_v1  ;;  %v277_v2 = vld [vmem:[%s395_s1 + $0x8] sm:$0xff]   ;;  %253 = vmatprep.subr.bf16.mxu1 %v310_v1  ;;  %v280_v7 = vld [vmem:[%s397_s3 + $0x10] sm:$0xff]  }
   0x2   :  { %246 = vmatpush3.bf16.msra.mxu0 %v276_v0  ;;  %249 = vmatprep.mubr.msk.bf16.mxu0 %vm311_vm0, %v310_v1  ;;  %v22_v3 = vld [vmem:[%s394_s0] sm:$0xff]  ;;  %v279_v6 = vld [vmem:[%s397_s3 + $0x8] sm:$0xff]  }
   0x3   :  { %247 = vmatprep.subr.bf16.mxu0 %v310_v1  ;;  %v278_v4 = vld [vmem:[%s397_s3] sm:$0xff]   ;;  %269 = vmatprep.mubr.msk.bf16.mxu1 %vm311_vm0, %v310_v1  ;;  %v23_v5 = vpack.c.bf16 %v22_v3, %v22_v3 }
   0x4   :  { %254 = vmatpush3.bf16.msra.mxu1 %v278_v4 }
   0x5   :  { %255 = vmatprep.subr.bf16.mxu1 %v310_v1 }
   0x6   :  { %248 = vmatpush3.bf16.msra.mxu0 %v277_v2 }
   0x8   :  { %256 = vmatpush3.bf16.msra.mxu1 %v279_v6 }
   0x9   :  { %250 = vmatmul.mubr.msk.bf16.vlgmr.msra.gmra.mrb[0].mxu0 %vm47_vm1, %v23_v5  ;;  %257 = vmatprep.subr.bf16.mxu1 %v310_v1 }
   0xa   :  { %10 = vsyncpa [#allocation3], 0  ;;  %v281_v8 = vld [vmem:[%s397_s3 + $0x18] sm:$0xff]   ;;  %v282_v9 = vld [vmem:[%s397_s3 + $0x20] sm:$0xff]   ;;  %s312_s17 = smov [#allocation2]   ;;  %vm204_vm2 = vcmask 130048  }
   0xb   :  { %v283_v10 = vld [vmem:[%s397_s3 + $0x28] sm:$0xff]   ;;  %v284_v11 = vld [vmem:[%s397_s3 + $0x30] sm:$0xff]   ;;  %v285_v12 = vld [vmem:[%s397_s3 + $0x38] sm:$0xff]   ;;  %s212_s18 = sshll.u32 %s312_s17, 4  ;;  %s213_s18 = int_to_ptr.vmem [resolvable:$true] %s212_s18 }
   0xc   :  { %258 = vmatpush3.bf16.msra.mxu1 %v280_v7  ;;  %v220_v13 = vld [vmem:[%s396_s2] ss:$0 sm:$0xff]  ;;  %s286_s2 = scalar_lea.vmem %s213_s18, 128  ;;  %p291_p1 = scmp.lt.s32.totalorder %s213_s18, %s213_s18 }
   0xd   :  { %259 = vmatprep.subr.bf16.mxu1 %v310_v1  ;;  %v224_v21 = vld [vmem:[%s398_s4] ss:$0 sm:$0xff]  ;;  %p287_p0 = scmp.ne.s32.totalorder %s213_s18, %s286_s2  ;;  %p292_p2 = scmp.lt.s32.totalorder %s286_s2, %s286_s2 }
   0xf   :  { %p293_p3 = por %p292_p2, %p291_p1 }
  0x10   :  { %260 = vmatpush3.bf16.msra.mxu1 %v281_v8 }
  0x11   :  { %261 = vmatprep.subr.bf16.mxu1 %v310_v1  ;;  %p294_p4 = pnand %p293_p3, %p287_p0 }
  0x14   :  { %262 = vmatpush3.bf16.msra.mxu1 %v282_v9 }
  0x15   :  { %263 = vmatprep.subr.bf16.mxu1 %v310_v1 }
  0x18   :  { %264 = vmatpush3.bf16.msra.mxu1 %v283_v10 }
  0x19   :  { %265 = vmatprep.subr.bf16.mxu1 %v310_v1 }
  0x1c   :  { %266 = vmatpush3.bf16.msra.mxu1 %v284_v11 }
  0x1d   :  { %267 = vmatprep.subr.bf16.mxu1 %v310_v1 }
  0x20   :  { %268 = vmatpush3.bf16.msra.mxu1 %v285_v12 }
  0xdc   :  { %v85_v14 = vpop.f32.mrb[0].mxu0 }
  0xdd   :  { %v86_v15 = vadd.f32 %v220_v13, %v85_v14  ;;  %v251_v16 = vpop.f32.mrb[1].mxu0 }
  0xde   :  { %v88_v17 = vpop.f32.mrb[2].mxu0 }
  0xdf   :  { %v91_v18 = vmax.f32 %v86_v15, 0.0  ;;  %v252_v19 = vpop.f32.mrb[3].mxu0 }
  0xe1   :  { %v92_v20 = vpack.c.bf16 %v91_v18, %v91_v18 }
  0xe3   :  { %270 = vmatmul.mubr.bf16.vlgmr.msra.gmra.mrb[0].mxu1 %v92_v20 }
 0x1b6   :  { %v198_v22 = vpop.f32.mrb[0].mxu1 }
 0x1b7   :  { %v199_v23 = vadd.f32 %v224_v21, %v198_v22  ;;  %v271_v24 = vpop.f32.mrb[1].mxu1 }
 0x1b8   :  { %v201_v25 = vpop.f32.mrb[2].mxu1 }
 0x1b9   :  { %v272_v26 = vpop.f32.mrb[3].mxu1  ;;  %205 = vst.msk [vmem:[#allocation2] sm:$0xff] %vm204_vm2, %v199_v23 }
 0x1ba   :  { %297 = shalt.err (!%p294_p4)
}
 0x1bb   :  { %s298_s4 = scalar_lea.hbm %s399_s5, 128 }
 0x1bc   :  { %p299_p5 = scmp.ne.s32.totalorder %s399_s5, %s298_s4  ;;  %p302_p6 = scmp.lt.u32.totalorder %s298_s4, %s399_s5 }
 0x1be   :  { %p304_p7 = pnand %p302_p6, %p299_p5 }
 0x1c0   :  { %307 = shalt.err (!%p304_p7)
}
 0x1c1   :  { %215 = dma.vmem_to_hbm [thread:$0]  %s213_s18, 128, %s399_s5, [#allocation3]  }
 0x1c2   :  { %308 = dma.done.wait [#allocation3], 128  }
 0x1c3   :  { %309 = vsyncadd [#allocation3], 4294967168 }
 0x1c4   :  { %219 = vsyncpa [#allocation3], 1 }

</bundles_post_ra>
